<compile_context>
chip_gen: v6e
topology: v6e:2x2x1
jax: 0.10.0
libtpu: 0.0.40
codegen_flags: <defaults>
</compile_context>

<pallas_src>
import functools

import jax
import jax.numpy as jnp
from jax.experimental import pallas as pl
from jax.experimental.pallas import tpu as pltpu


def _softplus(x):
    # numerically stable softplus (avoids log1p for maximum lowering safety)
    return jnp.maximum(x, 0.0) + jnp.log(1.0 + jnp.exp(-jnp.abs(x)))


def _fit_rows(c, row_elems, bytes_per_elem, budget_bytes):
    """Largest row-tile (multiple of 8, or full c) whose block fits the budget."""
    rows = budget_bytes // max(1, row_elems * bytes_per_elem)
    rows = max(8, (rows // 8) * 8)
    return c if rows >= c else rows


# ---------------------------------------------------------------------------
# Pass 1: row-tiled reduction producing per-part partial sums of
#   sum_i(x[i] . v_mu)   and   sum_i(softplus(x[i] . v_sig + c_sig))
# Grid = (parts, row_tiles); the "parts" axis is parallel (v7x megacore) and
# each part owns its own (8,128) accumulator block ("arbitrary" inner axis,
# pl.when init at t == 0).
# ---------------------------------------------------------------------------
def _moments_kernel(x_ref, v_ref, csig_ref, musum_ref, sigsum_ref, *,
                    tiles_per_part, rows_per_tile, total_rows):
    p = pl.program_id(0)
    t = pl.program_id(1)

    @pl.when(t == 0)
    def _init():
        musum_ref[...] = jnp.zeros_like(musum_ref)
        sigsum_ref[...] = jnp.zeros_like(sigsum_ref)

    g = p * tiles_per_part + t                       # global row-tile index
    x = x_ref[...].astype(jnp.float32)               # (tc, n)
    v_mu = v_ref[0:1, :]                             # (1, n)
    v_sig = v_ref[1:2, :]                            # (1, n)

    tc = x.shape[0]
    row_ids = g * rows_per_tile + jax.lax.broadcasted_iota(jnp.int32, (tc, 1), 0)
    valid = row_ids < total_rows                     # mask padded / duplicated rows

    mu_rows = jnp.sum(x * v_mu, axis=1, keepdims=True)                    # (tc, 1)
    sig_rows = jnp.sum(x * v_sig, axis=1, keepdims=True) + csig_ref[0]    # (tc, 1)

    mu_rows = jnp.where(valid, mu_rows, 0.0)
    sp_rows = jnp.where(valid, _softplus(sig_rows), 0.0)

    musum_ref[...] += jnp.broadcast_to(
        jnp.sum(mu_rows, axis=0, keepdims=True), musum_ref.shape)
    sigsum_ref[...] += jnp.broadcast_to(
        jnp.sum(sp_rows, axis=0, keepdims=True), sigsum_ref.shape)


def _moments(x, v, csig_arr):
    c, n = x.shape
    tc = _fit_rows(c, n, x.dtype.itemsize, 8 * 1024 * 1024)   # ~8 MiB x blocks
    num_tiles = pl.cdiv(c, tc)
    num_parts = 2 if num_tiles >= 2 else 1
    tiles_per_part = pl.cdiv(num_tiles, num_parts)
    last_tile = num_tiles - 1

    def x_index(p, t):
        # clamp keeps the DMA in-bounds when num_tiles is odd; the duplicated
        # tile contributes nothing because its rows fail the validity mask.
        return (jnp.minimum(p * tiles_per_part + t, last_tile), 0)

    kernel = functools.partial(
        _moments_kernel, tiles_per_part=tiles_per_part,
        rows_per_tile=tc, total_rows=c)

    pmu, psig = pl.pallas_call(
        kernel,
        out_shape=(jax.ShapeDtypeStruct((8 * num_parts, 128), jnp.float32),
                   jax.ShapeDtypeStruct((8 * num_parts, 128), jnp.float32)),
        grid=(num_parts, tiles_per_part),
        in_specs=[
            pl.BlockSpec((tc, n), x_index),                          # x row tile
            pl.BlockSpec((2, n), lambda p, t: (0, 0)),               # [v_mu; v_sig]
            pl.BlockSpec(memory_space=pltpu.MemorySpace.SMEM),       # c_sig scalar
        ],
        out_specs=(pl.BlockSpec((8, 128), lambda p, t: (p, 0)),
                   pl.BlockSpec((8, 128), lambda p, t: (p, 0))),
        compiler_params=pltpu.CompilerParams(
            dimension_semantics=("parallel", "arbitrary"),
            vmem_limit_bytes=40 * 1024 * 1024),
        cost_estimate=pl.CostEstimate(
            flops=4 * c * n, transcendentals=2 * c,
            bytes_accessed=c * n * x.dtype.itemsize + 2 * n * 4
                           + 2 * 8 * num_parts * 128 * 4),
    )(x, v, csig_arr)
    return pmu, psig, num_parts


# ---------------------------------------------------------------------------
# Pass 2: elementwise mask.  Combines the pass-1 partial sums (SMEM scalar
# math), computes the exact normalizer once per tile, and applies
#   out = x * sigmoid(mu + sigma*noise) * (1 + exp(-mu/sqrt(1+3.14/8*sigma^2)))
# ---------------------------------------------------------------------------
def _mask_kernel(pmu_ref, psig_ref, const_ref, x_ref, noise_ref, o_ref, *,
                 num_parts):
    c_mu = const_ref[0]
    inv_c = const_ref[1]

    mu_sum = pmu_ref[0, 0]
    sig_sum = psig_ref[0, 0]
    for p in range(1, num_parts):            # static unroll (num_parts is 1 or 2)
        mu_sum = mu_sum + pmu_ref[8 * p, 0]
        sig_sum = sig_sum + psig_ref[8 * p, 0]
    mu = mu_sum * inv_c + c_mu
    sigma = sig_sum * inv_c

    # exact 1/sigmoid(z) = 1 + exp(-z), evaluated as a (1,1) vector (EUP exp,
    # once per tile -- negligible). 3.14 (not pi) matches the PyTorch source.
    mu_v = mu + jnp.zeros((1, 1), jnp.float32)
    sig_v = sigma + jnp.zeros((1, 1), jnp.float32)
    z_v = mu_v * jax.lax.rsqrt(1.0 + (3.14 / 8.0) * sig_v * sig_v)
    inv_denom_v = 1.0 + jnp.exp(-z_v)

    x = x_ref[...].astype(jnp.float32)
    eps = mu + sigma * noise_ref[...]
    mask = 0.5 + 0.5 * jnp.tanh(0.5 * eps)   # == sigmoid(eps); one EUP op / element
    o_ref[...] = (x * (mask * inv_denom_v)).astype(o_ref.dtype)


def advanced_dropout(x, weight_h, bias_h, weight_mu, bias_mu,
                     weight_sigma, bias_sigma, rng_key):
    """Training-mode AdvancedDropout forward.  Returns (out, mu, sigma)."""
    c, n = x.shape
    f32 = jnp.float32
    hidden = weight_h.shape[0]

    wh = weight_h.astype(f32)
    wmu = weight_mu.astype(f32)
    wsig = weight_sigma.astype(f32)
    bh = jnp.broadcast_to(jnp.reshape(bias_h.astype(f32), (-1,)), (hidden,))

    # Algebraic fold of the three linears (tiny (1,hidden)x(hidden,n) matmuls).
    v = jnp.concatenate([wmu @ wh, wsig @ wh], axis=0)              # (2, n)
    c_mu_total = jnp.dot(wmu[0], bh) + bias_mu.astype(f32)[0]       # scalar
    c_sig = jnp.dot(wsig[0], bh) + bias_sigma.astype(f32)[0]        # scalar
    csig_arr = jnp.reshape(c_sig, (1,)).astype(f32)
    consts = jnp.stack([c_mu_total, jnp.asarray(1.0 / c, f32)])     # [c_mu+b_mu, 1/c]

    # Pass 1: per-part partial sums for mu and softplus-sigma.
    pmu, psig, num_parts = _moments(x, v, csig_arr)

    # Standard-normal noise (plain XLA RNG; off the pass-1 -> pass-2 critical
    # path).  TODO(synk): switch to the in-kernel hardware PRNG
    # (pltpu.prng_seed / prng_random_bits) on real Mosaic to drop one c*n
    # HBM stream -- it does not lower under the CPU interpreter.
    noise = jax.random.normal(rng_key, (c, n), dtype=f32)

    # Pass 2 tiling: lane-dense ~4 MiB blocks.
    tn = n if n <= 2048 else 2048
    tc2 = _fit_rows(c, tn, 4, 4 * 1024 * 1024)

    out = pl.pallas_call(
        functools.partial(_mask_kernel, num_parts=num_parts),
        out_shape=jax.ShapeDtypeStruct((c, n), x.dtype),
        grid=(pl.cdiv(c, tc2), pl.cdiv(n, tn)),
        in_specs=[
            pl.BlockSpec(memory_space=pltpu.MemorySpace.SMEM),      # pmu  (8P,128)
            pl.BlockSpec(memory_space=pltpu.MemorySpace.SMEM),      # psig (8P,128)
            pl.BlockSpec(memory_space=pltpu.MemorySpace.SMEM),      # consts (2,)
            pl.BlockSpec((tc2, tn), lambda i, j: (i, j)),           # x tile
            pl.BlockSpec((tc2, tn), lambda i, j: (i, j)),           # noise tile
        ],
        out_specs=pl.BlockSpec((tc2, tn), lambda i, j: (i, j)),
        compiler_params=pltpu.CompilerParams(
            dimension_semantics=("parallel", "parallel"),
            vmem_limit_bytes=40 * 1024 * 1024),
        cost_estimate=pl.CostEstimate(
            flops=8 * c * n, transcendentals=c * n,
            bytes_accessed=(2 * x.dtype.itemsize + 4) * c * n),
    )(pmu, psig, consts, x, noise)

    # mu / sigma returned for inspection (not on the critical path of `out`).
    mu = jnp.sum(pmu[0::8, 0]) / c + c_mu_total
    sigma = jnp.sum(psig[0::8, 0]) / c
    return out, mu, sigma


if __name__ == "__main__":
    # small shapes consistent with the module: batch c=8, num=128, reduction=8
    c, num, reduction = 8, 128, 8
    hidden = num // reduction
    init_mu, init_sigma = 0.0, 1.2

    key = jax.random.PRNGKey(0)
    kx, kwh, kbh, kwmu, kwsig, knoise = jax.random.split(key, 6)

    x = jax.random.normal(kx, (c, num), dtype=jnp.float32)
    weight_h = jax.random.uniform(kwh, (hidden, num), dtype=jnp.float32) * 0.01
    bias_h = jax.random.uniform(kbh, (1,), dtype=jnp.float32) * 0.01
    weight_mu = jax.random.uniform(kwmu, (1, hidden), dtype=jnp.float32) * 0.01
    bias_mu = jnp.array([init_mu], dtype=jnp.float32)
    weight_sigma = jax.random.uniform(kwsig, (1, hidden), dtype=jnp.float32) * 0.01
    bias_sigma = jnp.array([init_sigma], dtype=jnp.float32)

    out, mu, sigma = advanced_dropout(x, weight_h, bias_h, weight_mu, bias_mu,
                                      weight_sigma, bias_sigma, rng_key=knoise)
    out = jax.block_until_ready(out)

    # Pure-JAX reference of the PyTorch forward (same noise stream).
    h = x @ weight_h.T + bias_h
    mu_ref = jnp.mean(h @ weight_mu.T + bias_mu)
    sigma_ref = jnp.mean(jax.nn.softplus(h @ weight_sigma.T + bias_sigma))
    denom_ref = jax.nn.sigmoid(mu_ref / jnp.sqrt(1.0 + (3.14 / 8.0) * sigma_ref ** 2))
    noise_ref = jax.random.normal(knoise, (c, num), dtype=jnp.float32)
    out_ref = x * jax.nn.sigmoid(mu_ref + sigma_ref * noise_ref) / denom_ref

    assert out.shape == (c, num)
    assert bool(jnp.all(jnp.isfinite(out)))
    assert jnp.allclose(mu, mu_ref, rtol=1e-4, atol=1e-5), (float(mu), float(mu_ref))
    assert jnp.allclose(sigma, sigma_ref, rtol=1e-4, atol=1e-5), (float(sigma), float(sigma_ref))
    assert jnp.allclose(out, out_ref, rtol=1e-4, atol=1e-5)

    print("KERNEL_OK")
</pallas_src>

<mosaic_0001>
module attributes {stable_mosaic.version = 11 : i64} {
  func.func @_moments_kernel(%arg0: i32, %arg1: i32, %arg2: memref<8x128xf32, #tpu.memory_space<vmem>>, %arg3: memref<2x128xf32, #tpu.memory_space<vmem>>, %arg4: memref<1xf32, #tpu.memory_space<smem>>, %arg5: memref<8x128xf32, #tpu.memory_space<vmem>>, %arg6: memref<8x128xf32, #tpu.memory_space<vmem>>) attributes {dimension_semantics = [#tpu.dimension_semantics<parallel>, #tpu.dimension_semantics<arbitrary>], iteration_bounds = array<i64: 1, 1>, scalar_prefetch = 0 : i64, scratch_operands = 0 : i64, tpu.core_type = #tpu.core_type<tc>, window_params = [{transform_indices = @transform_0, window_bounds = array<i64: 8, 128>}, {pipeline_mode = #tpu.pipeline_mode<synchronous>, transform_indices = @transform_1, window_bounds = array<i64: 2, 128>}, {transform_indices = @transform_2, window_bounds = array<i64: 1>}, {transform_indices = @transform_3, window_bounds = array<i64: 8, 128>}, {transform_indices = @transform_4, window_bounds = array<i64: 8, 128>}]} {
    %c0_i32 = arith.constant 0 : i32
    %0 = arith.cmpi eq, %arg1, %c0_i32 : i32
    %1 = arith.extui %0 : i1 to i32
    %c0_i32_0 = arith.constant 0 : i32
    %2 = arith.cmpi ne, %1, %c0_i32_0 : i32
    scf.if %2 {
      %cst_23 = arith.constant 0.000000e+00 : f32
      %53 = vector.broadcast %cst_23 : f32 to vector<8x128xf32>
      %c0_24 = arith.constant 0 : index
      %c0_25 = arith.constant 0 : index
      %54 = vector.load %arg5[%c0_24, %c0_25] : memref<8x128xf32, #tpu.memory_space<vmem>>, vector<8x128xf32>
      tpu.vector_store %arg5[%c0_24, %c0_25], %53 {strides = array<i32>} : memref<8x128xf32, #tpu.memory_space<vmem>>, vector<8x128xf32>,
      %cst_26 = arith.constant 0.000000e+00 : f32
      %55 = vector.broadcast %cst_26 : f32 to vector<8x128xf32>
      %c0_27 = arith.constant 0 : index
      %c0_28 = arith.constant 0 : index
      %56 = vector.load %arg6[%c0_27, %c0_28] : memref<8x128xf32, #tpu.memory_space<vmem>>, vector<8x128xf32>
      tpu.vector_store %arg6[%c0_27, %c0_28], %55 {strides = array<i32>} : memref<8x128xf32, #tpu.memory_space<vmem>>, vector<8x128xf32>,
    } else {
    }
    %c1_i32 = arith.constant 1 : i32
    %3 = arith.muli %arg0, %c1_i32 : i32
    %4 = arith.addi %3, %arg1 : i32
    %c0 = arith.constant 0 : index
    %c0_1 = arith.constant 0 : index
    %5 = vector.load %arg2[%c0, %c0_1] : memref<8x128xf32, #tpu.memory_space<vmem>>, vector<8x128xf32>
    %c0_2 = arith.constant 0 : index
    %c0_3 = arith.constant 0 : index
    %6 = vector.load %arg3[%c0_2, %c0_3] : memref<2x128xf32, #tpu.memory_space<vmem>>, vector<1x128xf32>
    %c1 = arith.constant 1 : index
    %c0_4 = arith.constant 0 : index
    %7 = vector.load %arg3[%c1, %c0_4] : memref<2x128xf32, #tpu.memory_space<vmem>>, vector<1x128xf32>
    %c8_i32 = arith.constant 8 : i32
    %8 = arith.muli %4, %c8_i32 : i32
    %9 = tpu.iota {dimensions = array<i32: 0>} : vector<8x1xi32>
    %10 = vector.broadcast %8 : i32 to vector<8x1xi32>
    %11 = arith.addi %10, %9 : vector<8x1xi32>
    %c8_i32_5 = arith.constant 8 : i32
    %12 = vector.broadcast %c8_i32_5 : i32 to vector<8x1xi32>
    %13 = arith.cmpi slt, %11, %12 : vector<8x1xi32>
    %14 = vector.broadcast %6 : vector<1x128xf32> to vector<8x128xf32>
    %15 = arith.mulf %5, %14 : vector<8x128xf32>
    %cst = arith.constant dense<0.000000e+00> : vector<8xf32>
    %16 = vector.multi_reduction <add>, %15, %cst [1] : vector<8x128xf32> to vector<8xf32>
    %17 = vector.shape_cast %16 : vector<8xf32> to vector<8x1xf32>
    %18 = vector.broadcast %7 : vector<1x128xf32> to vector<8x128xf32>
    %19 = arith.mulf %5, %18 : vector<8x128xf32>
    %cst_6 = arith.constant dense<0.000000e+00> : vector<8xf32>
    %20 = vector.multi_reduction <add>, %19, %cst_6 [1] : vector<8x128xf32> to vector<8xf32>
    %21 = vector.shape_cast %20 : vector<8xf32> to vector<8x1xf32>
    %c0_7 = arith.constant 0 : index
    %22 = memref.load %arg4[%c0_7] : memref<1xf32, #tpu.memory_space<smem>>
    %23 = vector.broadcast %22 : f32 to vector<8x1xf32>
    %24 = arith.addf %21, %23 : vector<8x1xf32>
    %cst_8 = arith.constant 0.000000e+00 : f32
    %25 = vector.broadcast %cst_8 : f32 to vector<8x1xf32>
    %26 = arith.select %13, %17, %25 : vector<8x1xi1>, vector<8x1xf32>
    %cst_9 = arith.constant 0.000000e+00 : f32
    %27 = vector.broadcast %cst_9 : f32 to vector<8x1xf32>
    %28 = arith.maximumf %24, %27 : vector<8x1xf32>
    %29 = math.absf %24 : vector<8x1xf32>
    %cst_10 = arith.constant 0.000000e+00 : f32
    %30 = vector.broadcast %cst_10 : f32 to vector<8x1xf32>
    %31 = arith.subf %30, %29 : vector<8x1xf32>
    %32 = math.exp %31 : vector<8x1xf32>
    %cst_11 = arith.constant 1.000000e+00 : f32
    %33 = vector.broadcast %cst_11 : f32 to vector<8x1xf32>
    %34 = arith.addf %33, %32 : vector<8x1xf32>
    %35 = math.log %34 : vector<8x1xf32>
    %36 = arith.addf %28, %35 : vector<8x1xf32>
    %cst_12 = arith.constant 0.000000e+00 : f32
    %37 = vector.broadcast %cst_12 : f32 to vector<8x1xf32>
    %38 = arith.select %13, %36, %37 : vector<8x1xi1>, vector<8x1xf32>
    %c0_13 = arith.constant 0 : index
    %c0_14 = arith.constant 0 : index
    %39 = vector.load %arg5[%c0_13, %c0_14] : memref<8x128xf32, #tpu.memory_space<vmem>>, vector<8x128xf32>
    %cst_15 = arith.constant dense<0.000000e+00> : vector<1xf32>
    %40 = vector.multi_reduction <add>, %26, %cst_15 [0] : vector<8x1xf32> to vector<1xf32>
    %41 = vector.shape_cast %40 : vector<1xf32> to vector<1x1xf32>
    %42 = vector.shape_cast %41 : vector<1x1xf32> to vector<1x1xf32>
    %43 = vector.broadcast %42 : vector<1x1xf32> to vector<8x128xf32>
    %44 = arith.addf %39, %43 : vector<8x128xf32>
    %c0_16 = arith.constant 0 : index
    %c0_17 = arith.constant 0 : index
    %45 = vector.load %arg5[%c0_16, %c0_17] : memref<8x128xf32, #tpu.memory_space<vmem>>, vector<8x128xf32>
    tpu.vector_store %arg5[%c0_16, %c0_17], %44 {strides = array<i32>} : memref<8x128xf32, #tpu.memory_space<vmem>>, vector<8x128xf32>,
    %c0_18 = arith.constant 0 : index
    %c0_19 = arith.constant 0 : index
    %46 = vector.load %arg6[%c0_18, %c0_19] : memref<8x128xf32, #tpu.memory_space<vmem>>, vector<8x128xf32>
    %cst_20 = arith.constant dense<0.000000e+00> : vector<1xf32>
    %47 = vector.multi_reduction <add>, %38, %cst_20 [0] : vector<8x1xf32> to vector<1xf32>
    %48 = vector.shape_cast %47 : vector<1xf32> to vector<1x1xf32>
    %49 = vector.shape_cast %48 : vector<1x1xf32> to vector<1x1xf32>
    %50 = vector.broadcast %49 : vector<1x1xf32> to vector<8x128xf32>
    %51 = arith.addf %46, %50 : vector<8x128xf32>
    %c0_21 = arith.constant 0 : index
    %c0_22 = arith.constant 0 : index
    %52 = vector.load %arg6[%c0_21, %c0_22] : memref<8x128xf32, #tpu.memory_space<vmem>>, vector<8x128xf32>
    tpu.vector_store %arg6[%c0_21, %c0_22], %51 {strides = array<i32>} : memref<8x128xf32, #tpu.memory_space<vmem>>, vector<8x128xf32>,
    return
  }
  func.func @transform_0(%arg0: i32, %arg1: i32) -> (i32, i32) {
    %c1_i32 = arith.constant 1 : i32
    %0 = arith.muli %arg0, %c1_i32 : i32
    %1 = arith.addi %0, %arg1 : i32
    %c0_i32 = arith.constant 0 : i32
    %2 = arith.minsi %1, %c0_i32 : i32
    %c0_i32_0 = arith.constant 0 : i32
    %c0_i32_1 = arith.constant 0 : i32
    return %2, %c0_i32_0 : i32, i32
  }
  func.func @transform_1(%arg0: i32, %arg1: i32) -> (i32, i32) {
    %c0_i32 = arith.constant 0 : i32
    %c0_i32_0 = arith.constant 0 : i32
    %c0_i32_1 = arith.constant 0 : i32
    return %c0_i32, %c0_i32_0 : i32, i32
  }
  func.func @transform_2(%arg0: i32, %arg1: i32) -> i32 {
    %c0_i32 = arith.constant 0 : i32
    %c0_i32_0 = arith.constant 0 : i32
    return %c0_i32 : i32
  }
  func.func @transform_3(%arg0: i32, %arg1: i32) -> (i32, i32) {
    %c0_i32 = arith.constant 0 : i32
    %c0_i32_0 = arith.constant 0 : i32
    return %arg0, %c0_i32 : i32, i32
  }
  func.func @transform_4(%arg0: i32, %arg1: i32) -> (i32, i32) {
    %c0_i32 = arith.constant 0 : i32
    %c0_i32_0 = arith.constant 0 : i32
    return %arg0, %c0_i32 : i32, i32
  }
}

</mosaic_0001>

<bundles_post_ra>
// kernel: tpu_custom_call.1
= control target key start
LH: loop header
LB: loop body
LE: loop exit
PB: predicated region body
PF: predicated region fallthrough
CT: control target
= control target key end

     0   :  { %11 = vsyncpa [#allocation4], 0  ;;  %s254_s0 = inlined_call_operand.hbm [shape: f32[8,128], index: 0, kind: input, shape index: {}]   ;;  %s255_s1 = inlined_call_operand.vmem [shape: f32[2,128], index: 1, kind: input, shape index: {}]   ;;  %s256_s2 = inlined_call_operand.<no memory space> [shape: f32[1], index: 2, kind: input, shape index: {}]   ;;  %s257_s3 = inlined_call_operand.hbm [shape: f32[8,128], index: 3, kind: output, shape index: {0}]   ;;  %s258_s4 = inlined_call_operand.hbm [shape: f32[8,128], index: 4, kind: output, shape index: {1}]  }
   0x1   :  { %12 = vsyncpa [#allocation5], 0 }
   0x2   :  { %13 = vsyncpa [#allocation8], 0  ;;  %s208_s15 = smov [#allocation3]  }
   0x3   :  { %s25_s16 = sshll.u32 %s208_s15, 4  ;;  %s26_s16 = int_to_ptr.vmem [resolvable:$true] %s25_s16 }
   0x4   :  { %s150_s17 = scalar_lea.vmem %s26_s16, 128  ;;  %p155_p1 = scmp.lt.s32.totalorder %s26_s16, %s26_s16 }
   0x5   :  { %p151_p0 = scmp.ne.s32.totalorder %s26_s16, %s150_s17  ;;  %p156_p2 = scmp.lt.s32.totalorder %s150_s17, %s150_s17 }
   0x7   :  { %p157_p3 = por %p156_p2, %p155_p1 }
   0x9   :  { %p158_p4 = pnand %p157_p3, %p151_p0 }
   0xb   :  { %161 = shalt.err (!%p158_p4)
}
   0xc   :  { %28 = dma.hbm_to_vmem [thread:$0]  %s254_s0, 128, %s26_s16, [#allocation4]  }
   0xd   :  { %202 = dma.done.wait [#allocation4], 128  }
   0xe   :  { %203 = vsyncadd [#allocation4], 4294967168  ;;  %v46_v0 = vld [vmem:[#allocation3] sm:$0xff]  ;;  %v70_v5 = vstv %s256_s2  ;;  %s209_s0 = smov [#allocation6]  }
   0xf   :  { %v133_v1 = vld [vmem:[%s255_s1 + $0x1] ss:$0 sm:$0xff]  ;;  %v132_v2 = vld [vmem:[%s255_s1] ss:$0 sm:$0xff]  ;;  %s107_s1 = sshll.u32 %s209_s0, 4  ;;  %s108_s1 = int_to_ptr.vmem [resolvable:$true] %s107_s1 }
  0x10   :  { %v66_v3 = vmul.f32 %v133_v1, %v46_v0  ;;  %v59_v4 = vmul.f32 %v132_v2, %v46_v0  ;;  %s162_s26 = scalar_lea.vmem %s108_s1, 128  ;;  %p167_p6 = scmp.lt.s32.totalorder %s108_s1, %s108_s1 }
  0x11   :  { %p163_p5 = scmp.ne.s32.totalorder %s108_s1, %s162_s26  ;;  %p168_p7 = scmp.lt.s32.totalorder %s162_s26, %s162_s26 }
  0x12   :  { %67 = vadd.xlane.f32.xlu0 %v66_v3 }
  0x13   :  { %p169_p8 = por %p168_p7, %p167_p6 }
  0x15   :  { %p170_p9 = pnand %p169_p8, %p163_p5 }
  0x16   :  { %60 = vadd.xlane.f32.xlu0 %v59_v4 }
  0x9b   :  { %v68_v6 = vpop.xlane.xlu0 %67 }
  0x9c   :  { %v71_v7 = vadd.f32 %v70_v5, %v68_v6 }
  0x9e   :  { %v74_v8 = vand.u32 2147483647, %v71_v7 }
  0x9f   :  { %v61_v9 = vpop.xlane.xlu0 %60 }
  0xa0   :  { %v75_v10 = vsub.f32 0.0, %v74_v8  ;;  %v84_v11 = vrot.slane %v61_v9, 4 }
  0xa2   :  { %v76_v12 = vmul.f32 1.442695, %v75_v10  ;;  %v85_v13 = vadd.f32 %v84_v11, %v61_v9 }
  0xa4   :  { %138 = vpow2.f32 %v76_v12  ;;  %v86_v14 = vrot.slane %v85_v13, 2 }
  0xa6   :  { %v87_v15 = vadd.f32 %v86_v14, %v85_v13 }
  0xa8   :  { %v88_v16 = vrot.slane %v87_v15, 1 }
  0xaa   :  { %v89_v17 = vadd.f32 %v88_v16, %v87_v15 }
  0xac   :  { %91 = vst [vmem:[#allocation6] sm:$0xff] %v89_v17 }
  0xad   :  { %173 = shalt.err (!%p170_p9)
}
  0xae   :  { %110 = dma.vmem_to_hbm [thread:$0]  %s108_s1, 128, %s257_s3, [#allocation5]   ;;  %v73_v21 = vmax.f32 %v71_v7, 0.0 }
  0xaf   :  { %s210_s28 = smov [#allocation7]  }
  0xb0   :  { %s117_s29 = sshll.u32 %s210_s28, 4  ;;  %s118_s29 = int_to_ptr.vmem [resolvable:$true] %s117_s29 }
  0xb1   :  { %v139_v18 = vpop.eup %138  ;;  %s182_s30 = scalar_lea.vmem %s118_s29, 128  ;;  %p187_p11 = scmp.lt.s32.totalorder %s118_s29, %s118_s29 }
  0xb2   :  { %v78_v19 = vadd.f32 1.0, %v139_v18  ;;  %p183_p10 = scmp.ne.s32.totalorder %s118_s29, %s182_s30  ;;  %p188_p12 = scmp.lt.s32.totalorder %s182_s30, %s182_s30 }
  0xb4   :  { %140 = vlog2.f32 %v78_v19  ;;  %p189_p13 = por %p188_p12, %p187_p11 }
  0xb6   :  { %p190_p0 = pnand %p189_p13, %p183_p10 }
  0xc1   :  { %v141_v20 = vpop.eup %140 }
  0xc2   :  { %v80_v22 = vmul.f32 0.6931472, %v141_v20 }
  0xc4   :  { %v81_v23 = vadd.f32 %v80_v22, %v73_v21 }
  0xc6   :  { %v93_v24 = vrot.slane %v81_v23, 4 }
  0xc8   :  { %v94_v25 = vadd.f32 %v93_v24, %v81_v23 }
  0xca   :  { %v95_v26 = vrot.slane %v94_v25, 2 }
  0xcc   :  { %v96_v27 = vadd.f32 %v95_v26, %v94_v25 }
  0xce   :  { %v97_v28 = vrot.slane %v96_v27, 1 }
  0xd0   :  { %v98_v29 = vadd.f32 %v97_v28, %v96_v27 }
  0xd2   :  { %100 = vst [vmem:[#allocation7] sm:$0xff] %v98_v29 }
  0xd3   :  { %193 = shalt.err (!%p190_p0)
}
  0xd4   :  { %120 = dma.vmem_to_hbm [thread:$0]  %s118_s29, 128, %s258_s4, [#allocation8]  }
  0xd5   :  { %204 = dma.done.wait [#allocation5], 128  }
  0xd6   :  { %205 = vsyncadd [#allocation5], 4294967168 }
  0xd7   :  { %206 = dma.done.wait [#allocation8], 128  }
  0xd8   :  { %207 = vsyncadd [#allocation8], 4294967168 }
  0xd9   :  { %127 = vsyncpa [#allocation4], 1 }
  0xda   :  { %128 = vsyncpa [#allocation5], 1 }
  0xdb   :  { %129 = vsyncpa [#allocation8], 1 }

</bundles_post_ra>
